<compile_context>
chip_gen: v5e
topology: v5e:2x2
jax: 0.10.0
libtpu: 0.0.40
codegen_flags: <defaults>
</compile_context>

<pallas_src>
import jax
import jax.numpy as jnp
from jax import lax
from jax.experimental import pallas as pl
from jax.experimental.pallas import tpu as pltpu


def pool_normalize_kernel(emb_ref, mask_ref, out_ref, acc_ref):
    """One (batch-tile, seq-tile) grid step of masked mean pooling + L2 normalize.

    emb_ref  : [TB, TS, H]  f32/bf16 block of last_hidden_state
    mask_ref : [TB, 1, TS]  same dtype as emb (0/1 values), lane-major in S
    out_ref  : [TB, H]      f32, written on the last seq step only
    acc_ref  : [TB, 1, H]   f32 VMEM accumulator, persistent across the seq grid axis
    """
    s = pl.program_id(1)

    @pl.when(s == 0)
    def _():
        acc_ref[...] = jnp.zeros_like(acc_ref)

    emb = emb_ref[...]                      # [TB, TS, H]
    mask = mask_ref[...]                    # [TB, 1, TS] (already emb dtype; 0/1 exact in bf16)

    # torch.sum(token_embeddings * input_mask_expanded, 1), one seq tile at a time.
    # Batched [1,TS] x [TS,H] matmul: the seq contraction runs on the MXU with f32
    # accumulation; no [TB,TS,H] mask-broadcast temp, no lane->sublane relayout.
    acc_ref[...] += jnp.einsum("bks,bsh->bkh", mask.astype(emb.dtype), emb,
                               preferred_element_type=jnp.float32)

    @pl.when(s == pl.num_programs(1) - 1)
    def _():
        # F.normalize(summed / count): the 1/count cancels against the L2 norm, so
        #   out = summed * rsqrt(max(||summed||^2, 1e-24)).
        # All-padding rows give 0 (matching torch's clamps); differs from torch only when
        # ||summed|| < count * 1e-12 — microscopic and never hit with real embeddings.
        acc = acc_ref[...]                                     # [TB, 1, H] f32
        sq = jnp.sum(acc * acc, axis=-1, keepdims=True)        # [TB, 1, 1]
        inv_norm = lax.rsqrt(jnp.maximum(sq, 1e-24))           # EUP rsqrt (free slot)
        out_ref[...] = (acc * inv_norm)[:, 0, :].astype(out_ref.dtype)   # sublane-dense [TB, H]


def _choose_blocks(B, S, H, itemsize, target_bytes):
    """Pick (block_b, block_s) for an HBM-bound streaming kernel."""
    # Seq tiling only when S is a multiple of 128: keeps mask blocks lane-aligned and the
    # chosen tile always divides S exactly, so no padded-garbage seq rows feed the accumulator.
    block_s = S
    if S % 128 == 0 and S > 128:
        divs = [d for d in range(128, S + 1, 128) if S % d == 0]
        fit = [d for d in divs if d * H * itemsize <= target_bytes]
        block_s = max(fit) if fit else min(divs)
        if block_s == S and len(divs) > 1:
            block_s = sorted(divs)[-2]   # prefer >=2 seq steps so double-buffering has work at tiny B
    # Batch tiling: fill up to the target bytes, but keep >=2 grid steps along B so
    # ("parallel", ...) can shard across v7x's two TensorCores and v5e/v6e get pipeline overlap.
    row_bytes = block_s * H * itemsize
    block_b = max(1, min(B, target_bytes // max(1, row_bytes)))
    block_b = max(1, min(block_b, (B + 1) // 2))
    return block_b, block_s


def _vmem_limit_bytes(block_bytes):
    phys = 64 * 1024 * 1024                     # assume v7x (smallest VMEM) if query unavailable
    try:
        cap = getattr(pltpu.get_tpu_info(), "vmem_capacity_bytes", None)
        if cap:
            phys = int(cap)
    except Exception:
        pass
    # Double-buffered in/out blocks + slack, capped well below physical VMEM (<=56 MiB on v7x).
    want = max(32 * 1024 * 1024, 4 * block_bytes)
    return int(min(phys * 7 // 8, want))


def generator_preprocess(token_embeddings, attention_mask, *,
                         block_b=None, block_s=None,
                         target_block_bytes=8 * 1024 * 1024):
    """Pallas wrapper: masked mean pooling + L2 normalize.

    token_embeddings : [B, S, H] float32 or bfloat16 (stand-in for last_hidden_state)
    attention_mask   : [B, S]    int/bool/float (0/1)
    returns          : [B, H]    float32, unit-L2 rows
    """
    B, S, H = token_embeddings.shape
    assert attention_mask.shape == (B, S)
    assert H % 128 == 0, "hidden dim must be a multiple of 128 lanes (MiniLM H=384 is)"

    emb_dtype = token_embeddings.dtype
    itemsize = jnp.dtype(emb_dtype).itemsize

    auto_b, auto_s = _choose_blocks(B, S, H, itemsize, target_block_bytes)
    if block_b is None:
        block_b = auto_b
    block_b = max(1, min(block_b, B))
    if block_s is None:
        block_s = auto_s
    assert S % block_s == 0, "seq tile must divide S (padded seq rows would pollute the sum)"

    grid_b = pl.cdiv(B, block_b)
    grid_s = S // block_s

    # Mask pre-cast to the embedding dtype and laid out [B, 1, S] (lane-major in S) in XLA,
    # so the kernel needs no int->float convert or relayout; 0/1 are exact in bf16.
    mask3 = attention_mask.astype(emb_dtype).reshape(B, 1, S)

    block_bytes = block_b * (block_s * H * itemsize     # embedding block
                             + block_s * itemsize       # mask block
                             + 2 * H * 4)               # out block + f32 accumulator
    vmem_limit = _vmem_limit_bytes(block_bytes)

    # NOTE: if B % block_b != 0 the trailing block reads padded/undefined batch rows; those
    # output rows are discarded and rows are independent, so any garbage/NaN stays confined.
    out = pl.pallas_call(
        pool_normalize_kernel,
        out_shape=jax.ShapeDtypeStruct((B, H), jnp.float32),
        grid=(grid_b, grid_s),
        in_specs=[
            pl.BlockSpec((block_b, block_s, H), lambda i, s: (i, s, 0)),
            pl.BlockSpec((block_b, 1, block_s), lambda i, s: (i, 0, s)),
        ],
        out_specs=pl.BlockSpec((block_b, H), lambda i, s: (i, 0)),
        scratch_shapes=[pltpu.VMEM((block_b, 1, H), jnp.float32)],
        compiler_params=pltpu.CompilerParams(
            dimension_semantics=("parallel", "arbitrary"),   # batch rows independent; seq is a reduction
            vmem_limit_bytes=vmem_limit,
        ),
    )(token_embeddings, mask3)

    return out


def reference(token_embeddings, attention_mask):
    """Pure-JAX reference reproducing torch mean_pooling + F.normalize (p=2, dim=1)."""
    emb = token_embeddings.astype(jnp.float32)
    m = attention_mask.astype(jnp.float32)[:, :, None]
    summed = jnp.sum(emb * m, axis=1)
    counts = jnp.maximum(jnp.sum(m, axis=1), 1e-9)
    pooled = summed / counts
    norm = jnp.maximum(jnp.linalg.norm(pooled, axis=1, keepdims=True), 1e-12)
    return pooled / norm


if __name__ == "__main__":
    # Small shapes consistent with the module: hidden=384 (all-MiniLM-L6-v2), seq=8.
    H, S = 384, 8

    def run_case(B, dtype, tol):
        key = jax.random.PRNGKey(0)
        # Synthetic stand-in for model_output[0] (last_hidden_state).
        emb = jax.random.normal(key, (B, S, H), dtype=jnp.float32).astype(dtype)
        # Attention mask with per-sample padding (valid lengths 1..S).
        lengths = (jnp.arange(B, dtype=jnp.int32) % S) + 1
        attention_mask = (jnp.arange(S, dtype=jnp.int32)[None, :]
                          < lengths[:, None]).astype(jnp.int32)

        out = jax.block_until_ready(generator_preprocess(emb, attention_mask))
        ref = reference(emb, attention_mask)
        assert out.shape == (B, H)
        assert jnp.allclose(out, ref, atol=tol, rtol=tol), f"mismatch B={B} dtype={dtype}"
        assert jnp.allclose(jnp.linalg.norm(out, axis=1), 1.0, atol=tol)

    run_case(16, jnp.float32, 1e-5)    # multi-tile grid: block_b=8, grid=(2,1), aligned [8,384] output blocks
    run_case(2, jnp.float32, 1e-5)     # deployment-like batch: block_b=1, grid=(2,1) -> both v7x TCs busy
    run_case(16, jnp.bfloat16, 2e-2)   # bf16 embeddings: half the HBM traffic, f32 MXU accumulation

    print("KERNEL_OK")
</pallas_src>

<mosaic_0001>
module attributes {stable_mosaic.version = 11 : i64} {
  func.func @pool_normalize_kernel(%arg0: i32, %arg1: i32, %arg2: memref<8x8x384xf32, #tpu.memory_space<vmem>>, %arg3: memref<8x1x8xf32, #tpu.memory_space<vmem>>, %arg4: memref<8x384xf32, #tpu.memory_space<vmem>>, %arg5: memref<8x1x384xf32, #tpu.memory_space<vmem>>) attributes {dimension_semantics = [#tpu.dimension_semantics<parallel>, #tpu.dimension_semantics<arbitrary>], iteration_bounds = array<i64: 2, 1>, scalar_prefetch = 0 : i64, scratch_operands = 1 : i64, tpu.core_type = #tpu.core_type<tc>, window_params = [{transform_indices = @transform_0, window_bounds = array<i64: 8, 8, 384>}, {transform_indices = @transform_1, window_bounds = array<i64: 8, 1, 8>}, {transform_indices = @transform_2, window_bounds = array<i64: 8, 384>}]} {
    %c0_i32 = arith.constant 0 : i32
    %0 = arith.cmpi eq, %arg1, %c0_i32 : i32
    %1 = arith.extui %0 : i1 to i32
    %c0_i32_0 = arith.constant 0 : i32
    %2 = arith.cmpi ne, %1, %c0_i32_0 : i32
    scf.if %2 {
      %cst_14 = arith.constant 0.000000e+00 : f32
      %12 = vector.broadcast %cst_14 : f32 to vector<8x1x384xf32>
      %c0_15 = arith.constant 0 : index
      %c0_16 = arith.constant 0 : index
      %c0_17 = arith.constant 0 : index
      %13 = vector.load %arg5[%c0_15, %c0_16, %c0_17] : memref<8x1x384xf32, #tpu.memory_space<vmem>>, vector<8x1x384xf32>
      tpu.vector_store %arg5[%c0_15, %c0_16, %c0_17], %12 {strides = array<i32>} : memref<8x1x384xf32, #tpu.memory_space<vmem>>, vector<8x1x384xf32>,
    } else {
    }
    %c0 = arith.constant 0 : index
    %c0_1 = arith.constant 0 : index
    %c0_2 = arith.constant 0 : index
    %3 = vector.load %arg2[%c0, %c0_1, %c0_2] : memref<8x8x384xf32, #tpu.memory_space<vmem>>, vector<8x8x384xf32>
    %c0_3 = arith.constant 0 : index
    %c0_4 = arith.constant 0 : index
    %c0_5 = arith.constant 0 : index
    %4 = vector.load %arg3[%c0_3, %c0_4, %c0_5] : memref<8x1x8xf32, #tpu.memory_space<vmem>>, vector<8x1x8xf32>
    %c0_6 = arith.constant 0 : index
    %c0_7 = arith.constant 0 : index
    %c0_8 = arith.constant 0 : index
    %5 = vector.load %arg5[%c0_6, %c0_7, %c0_8] : memref<8x1x384xf32, #tpu.memory_space<vmem>>, vector<8x1x384xf32>
    "tpu.trace_start"() <{level = 10 : i32, message = "bks,bsh->bkh"}> : () -> ()
    %cst = arith.constant dense<0.000000e+00> : vector<8x1x384xf32>
    %6 = tpu.matmul %4, %3, %cst {dimension_numbers = #tpu.dot_dimension_numbers<[2], [1], [1], [2], [0, 0, 0, 1, 1, 2], [0], [0]>} : vector<8x1x8xf32>, vector<8x8x384xf32>, vector<8x1x384xf32> -> vector<8x1x384xf32>
    "tpu.trace_stop"() : () -> ()
    %7 = arith.addf %5, %6 : vector<8x1x384xf32>
    %c0_9 = arith.constant 0 : index
    %c0_10 = arith.constant 0 : index
    %c0_11 = arith.constant 0 : index
    %8 = vector.load %arg5[%c0_9, %c0_10, %c0_11] : memref<8x1x384xf32, #tpu.memory_space<vmem>>, vector<8x1x384xf32>
    tpu.vector_store %arg5[%c0_9, %c0_10, %c0_11], %7 {strides = array<i32>} : memref<8x1x384xf32, #tpu.memory_space<vmem>>, vector<8x1x384xf32>,
    %c0_i32_12 = arith.constant 0 : i32
    %9 = arith.cmpi eq, %arg1, %c0_i32_12 : i32
    %10 = arith.extui %9 : i1 to i32
    %c0_i32_13 = arith.constant 0 : i32
    %11 = arith.cmpi ne, %10, %c0_i32_13 : i32
    scf.if %11 {
      %c0_14 = arith.constant 0 : index
      %c0_15 = arith.constant 0 : index
      %c0_16 = arith.constant 0 : index
      %12 = vector.load %arg5[%c0_14, %c0_15, %c0_16] : memref<8x1x384xf32, #tpu.memory_space<vmem>>, vector<8x1x384xf32>
      %13 = arith.mulf %12, %12 : vector<8x1x384xf32>
      %cst_17 = arith.constant dense<0.000000e+00> : vector<8x1xf32>
      %14 = vector.multi_reduction <add>, %13, %cst_17 [2] : vector<8x1x384xf32> to vector<8x1xf32>
      %15 = vector.shape_cast %14 : vector<8x1xf32> to vector<8x1x1xf32>
      %cst_18 = arith.constant 1.000000e-24 : f32
      %16 = vector.broadcast %cst_18 : f32 to vector<8x1x1xf32>
      %17 = arith.maximumf %15, %16 : vector<8x1x1xf32>
      %18 = math.rsqrt %17 : vector<8x1x1xf32>
      %19 = vector.broadcast %18 : vector<8x1x1xf32> to vector<8x1x384xf32>
      %20 = arith.mulf %12, %19 : vector<8x1x384xf32>
      %21 = vector.shape_cast %20 : vector<8x1x384xf32> to vector<8x384xf32>
      %c0_19 = arith.constant 0 : index
      %c0_20 = arith.constant 0 : index
      %22 = vector.load %arg4[%c0_19, %c0_20] : memref<8x384xf32, #tpu.memory_space<vmem>>, vector<8x384xf32>
      tpu.vector_store %arg4[%c0_19, %c0_20], %21 {strides = array<i32>} : memref<8x384xf32, #tpu.memory_space<vmem>>, vector<8x384xf32>,
    } else {
    }
    return
  }
  func.func @transform_0(%arg0: i32, %arg1: i32) -> (i32, i32, i32) {
    %c0_i32 = arith.constant 0 : i32
    %c0_i32_0 = arith.constant 0 : i32
    return %arg0, %arg1, %c0_i32 : i32, i32, i32
  }
  func.func @transform_1(%arg0: i32, %arg1: i32) -> (i32, i32, i32) {
    %c0_i32 = arith.constant 0 : i32
    %c0_i32_0 = arith.constant 0 : i32
    return %arg0, %c0_i32, %arg1 : i32, i32, i32
  }
  func.func @transform_2(%arg0: i32, %arg1: i32) -> (i32, i32) {
    %c0_i32 = arith.constant 0 : i32
    %c0_i32_0 = arith.constant 0 : i32
    return %arg0, %c0_i32 : i32, i32
  }
}

</mosaic_0001>

<bundles_post_ra>
// kernel: tpu_custom_call.1
= control target key start
LH: loop header
LB: loop body
LE: loop exit
PB: predicated region body
PF: predicated region fallthrough
CT: control target
= control target key end

     0   :  { %7 = vsyncpa [#allocation4], 0  ;;  %s1807_s0 = inlined_call_operand.hbm [shape: f32[16,8,384], index: 0, kind: input, shape index: {}]   ;;  %s1808_s1 = inlined_call_operand.vmem [shape: f32[16,1,8], index: 1, kind: input, shape index: {}]   ;;  %s1809_s2 = inlined_call_operand.hbm [shape: f32[16,384], index: 2, kind: output, shape index: {}]  }
   0x1   :  { %9 = vsyncpa [#allocation4 + $0x1], 0 }
   0x2   :  { %10 = vsyncpa [#allocation5], 0 }
   0x3   :  { %12 = vsyncpa [#allocation5 + $0x1], 0  ;;  %s1506_s9 = smov 0   ;;  %s1508_s10 = smov 0  }
   0x4   :  { %s1510_s11 = smov 0   ;;  %s1512_s12 = smov 0  }
   0x5   :  { %s1514_s13 = smov 0   ;;  %s1516_s14 = smov 0  }
   0x6 LB: > { %s1252_s15 = sadd.s32 4294967295, %s1486_s14   ;;  %s1253_s16 = sadd.s32 4294967294, %s1486_s14   ;;  %s1486_s14 = sphi %s1516_s14, %s18_s14   ;;  %s1482_s13 = sphi %s1514_s13, %s1820_s13   ;;  %s1478_s12 = sphi %s1512_s12, %s1819_s12   ;;  %s1474_s11 = sphi %s1510_s11, %s1818_s11   ;;  %s1470_s10 = sphi %s1508_s10, %s1817_s10   ;;  %s1466_s9 = sphi %s1506_s9, %s1816_s9  }
   0x7   : > { %s30_s17 = sadd.s32 1, %s1482_s13  ;;  %s39_s18 = sadd.s32 1, %s1474_s11 }
   0x8   : > { %p32_p0 = scmp.ge.s32.totalorder %s30_s17, 2  ;;  %p46_p1 = scmp.ne.s32.totalorder %s1474_s11, %s1470_s10 }
   0x9   : > { %p47_p2 = scmp.eq.s32.totalorder %s1486_s14, 0  ;;  %p52_p3 = scmp.ne.s32.totalorder %s1470_s10, %s1466_s9 }
   0xa   : > { %s1822_s17 = smov (%p32_p0, %s30_s17), 0  ;;  %p53_p5 = scmp.eq.s32.totalorder %s1252_s15, 0 }
   0xb   : > { %p1547_p4 = por %p47_p2, %p46_p1  ;;  %s34_s20 = ssub.s32 %s1482_s13, %s1822_s17 }
   0xc   : > { %p104_p6 = scmp.eq.s32.totalorder %s1252_s15, 1  ;;  %p37_p7 = scmp.eq.s32.totalorder %s34_s20, 0 }
   0xd   : > { %p1553_p8 = por %p53_p5, %p52_p3  ;;  %p110_p10 = scmp.eq.s32.totalorder %s1253_s16, 1 }
   0xe   : > { %p1557_p9 = por %p104_p6, %p46_p1  ;;  %p1255_p12 = scmp.ge.s32.totalorder %s1486_s14, 2 }
   0xf   : > { %s1562_s23 = scalar_select %p37_p7, %s1474_s11, %s39_s18  }
  0x10   : > { %p1564_p11 = por %p110_p10, %p52_p3  ;;  %p1305_p13 = scmp.lt.s32.totalorder %s1486_s14, 2 }
  0x11   : > { %s130_s25 = sand.u32 1, %s1474_s11   ;;  %s1289_s27 = smul.u32 192, %s1482_s13 }
  0x12   : > { %s1288_s26 = smul.u32 192, %s130_s25  ;;  %p1298_p0 = pnand %p1305_p13, %p1547_p4 }
  0x13   : > { %s142_s30 = scalar_lea.hbm %s1807_s0, %s1289_s27  ;;  %p1259_p1 = scmp.ge.s32.totalorder %s1486_s14, 1 }
  0x14   : > { %s134_s3 = scalar_lea.vmem [#allocation3], %s1288_s26  ;;  %s143_s5 = sshll.u32 %s142_s30, 4  ;;  %s144_s5 = int_to_ptr.hbm [resolvable:$true] %s143_s5 }
  0x15   : > { %s145_s4 = sshll.u32 %s134_s3, 4  ;;  %s131_s6 = scalar_lea.sflag [#allocation4], %s130_s25  ;;  %s146_s4 = int_to_ptr.vmem [resolvable:$true] %s145_s4 }
  0x16   : > { %s1488_s7 = smov 384   ;;  %s1489_s8 = smov 24  }
  0x17   : > { %1300 = dma.hbm_to_vmem [thread:$0]  (!%p1298_p0), %s144_s5, 3072, %s146_s4, %s131_s6, %s1488_s7, %s1488_s7, %s1489_s8  }
  0x18   : > { %p164_p2 = scmp.lt.s32.totalorder %s1486_s14, 3 }
  0x1a   : > { %p165_p3 = pnand %p1259_p1, %p164_p2 }
  0x1b   : > { %s1580_s15 = sand.u32 (!%p165_p3), 1, %s1470_s10  }
  0x1c   : > { %168 = sbr.rel (%p165_p3) target bundleno = 388 (0x184), region = 28  ;;  %s171_s18 = scalar_lea.sflag (!%p165_p3), [#allocation4], %s1580_s15 }
  0x1d   : > { %s1290_s16 = smul.u32 (!%p165_p3), 192, %s1580_s15 }
  0x1f   : > { %s1584_s19 = scalar_lea.vmem (!%p165_p3), [#allocation3], %s1290_s16 }
  0x21   : > { %1457 = dma.done.wait (%p1553_p8), %s171_s18, 3072  }
  0x22   : > { %1459 = vsyncadd (%p1553_p8), %s171_s18, 4294964224  ;;  %s1260_s20 = sshll.u32 %s1478_s12, 3  ;;  %vm268_vm0 = vcmask 64512   ;;  %v228_v0 = vld [vmem:[%s1584_s19] sm:$0xff]  ;;  %v230_v1 = vld [vmem:[%s1584_s19 + $0x10] sm:$0xff]  ;;  %v216_v32 = vlaneseq  ;;  %v1490_v34 = vmov 0.0  }
  0x23   : > { %p205_p4 = scmp.lt.s32.totalorder %s1260_s20, 15  ;;  %v231_v2 = vld [vmem:[%s1584_s19 + $0x18] sm:$0xff]  ;;  %287 = vmatpush.msra.mxu0 %v228_v0  ;;  %327 = vmatpush.msra.mxu2 %v230_v1  ;;  %v229_v4 = vld [vmem:[%s1584_s19 + $0x8] sm:$0xff]  ;;  %v234_v6 = vld [vmem:[%s1584_s19 + $0x30] sm:$0xff]  ;;  %vm813_vm2 = vcmask 1040384   ;;  %vm815_vm3 = vcmask 1041408  }
  0x24   : > { %350 = vmatpush.msra.mxu3 %v231_v2  ;;  %v235_v7 = vld [vmem:[%s1584_s19 + $0x38] sm:$0xff]  ;;  %307 = vmatpush.msra.mxu1 %v229_v4  ;;  %v232_v8 = vld [vmem:[%s1584_s19 + $0x20] sm:$0xff]  ;;  %v233_v9 = vld [vmem:[%s1584_s19 + $0x28] sm:$0xff]  ;;  %vm1652_vm1 = vcmp.lt.s32.totalorder %v216_v32, 384  ;;  %s1291_s21 = smul.u32 24, %s1580_s15  ;;  %s1143_s7 = scalar_lea.sflag [#allocation5], %s1580_s15 }
  0x25   : > { %s1824_s20 = smov (!%p205_p4, %s1260_s20), 15  ;;  %413 = vmatpush.msrb.mxu2 %v234_v6  ;;  %v238_v10 = vld [vmem:[%s1584_s19 + $0x50] sm:$0xff]  ;;  %v239_v11 = vld [vmem:[%s1584_s19 + $0x58] sm:$0xff]  ;;  %v236_v12 = vld [vmem:[%s1584_s19 + $0x40] sm:$0xff]  ;;  %370 = vmatpush.msrb.mxu0 %v232_v8  ;;  %220 = vst.msk [vmem:[#allocation2] sm:$0x7] %vm1652_vm1, %v1490_v34 }
  0x26   : > { %s1594_s27 = scalar_lea.vmem %s1808_s1, %s1824_s20  ;;  %433 = vmatpush.msrb.mxu3 %v235_v7  ;;  %v237_v13 = vld [vmem:[%s1584_s19 + $0x48] sm:$0xff]  ;;  %390 = vmatpush.msrb.mxu1 %v233_v9  ;;  %v240_v15 = vld [vmem:[%s1584_s19 + $0x60] sm:$0xff]  ;;  %v242_v16 = vld [vmem:[%s1584_s19 + $0x70] sm:$0xff]  ;;  %221 = vst.msk [vmem:[#allocation2 + $0x3] sm:$0x7] %vm1652_vm1, %v1490_v34  ;;  %s1292_s28 = smul.u32 24, %s1478_s12 }
  0x27   : > { %v252_v3 = vld [vmem:[%s1594_s27] sm:$0x1]  ;;  %v253_v5 = vld [vmem:[%s1594_s27 + $0x1] sm:$0x1]  ;;  %v254_v14 = vld [vmem:[%s1594_s27 + $0x2] sm:$0x1] }
  0x28   : > { %1261 = vmatmul.msk.f32.vlgmr.msra.gmra.mxu0 %vm268_vm0, %v252_v3  ;;  %1263 = vmatmul.msk.f32.vlgmr.msra.gmra.mxu2 %vm268_vm0, %v252_v3  ;;  %v243_v17 = vld [vmem:[%s1584_s19 + $0x78] sm:$0xff]  ;;  %v241_v18 = vld [vmem:[%s1584_s19 + $0x68] sm:$0xff]  ;;  %v255_v19 = vld [vmem:[%s1594_s27 + $0x3] sm:$0x1]  ;;  %222 = vst.msk [vmem:[#allocation2 + $0x6] sm:$0x7] %vm1652_vm1, %v1490_v34  ;;  %s1154_s3 = scalar_lea.hbm %s1809_s2, %s1292_s28 }
  0x29   : > { %1264 = vmatmul.msk.f32.vlgmr.msra.gmra.mxu3 %vm268_vm0, %v253_v5  ;;  %1262 = vmatmul.msk.f32.vlgmr.msra.gmra.mxu1 %vm268_vm0, %v252_v3  ;;  %v244_v20 = vld [vmem:[%s1584_s19 + $0x80] sm:$0xff]  ;;  %v246_v21 = vld [vmem:[%s1584_s19 + $0x90] sm:$0xff]  ;;  %v247_v22 = vld [vmem:[%s1584_s19 + $0x98] sm:$0xff]  ;;  %223 = vst.msk [vmem:[#allocation2 + $0x9] sm:$0x7] %vm1652_vm1, %v1490_v34  ;;  %s202_s4 = scalar_lea.vmem [#allocation6], %s1291_s21 }
  0x2a   : > { %496 = vmatpush.msra.mxu2 %v238_v10  ;;  %516 = vmatpush.msra.mxu3 %v239_v11  ;;  %v245_v23 = vld [vmem:[%s1584_s19 + $0x88] sm:$0xff]  ;;  %v256_v24 = vld [vmem:[%s1594_s27 + $0x4] sm:$0x1]  ;;  %v257_v26 = vld [vmem:[%s1594_s27 + $0x5] sm:$0x1]  ;;  %s1156_s5 = sshll.u32 %s202_s4, 4  ;;  %s1157_s5 = int_to_ptr.vmem [resolvable:$true] %s1156_s5 }
  0x2b   : > { %453 = vmatpush.msra.mxu0 %v236_v12  ;;  %476 = vmatpush.msra.mxu1 %v237_v13  ;;  %v248_v25 = vld [vmem:[%s1584_s19 + $0xa0] sm:$0xff]  ;;  %v250_v27 = vld [vmem:[%s1584_s19 + $0xb0] sm:$0xff]  ;;  %v251_v28 = vld [vmem:[%s1584_s19 + $0xb8] sm:$0xff]  ;;  %224 = vst.msk [vmem:[#allocation2 + $0xc] sm:$0x7] %vm1652_vm1, %v1490_v34  ;;  %s1158_s6 = sshll.u32 %s1154_s3, 4  ;;  %s1159_s6 = int_to_ptr.hbm [resolvable:$true] %s1158_s6 }
  0x2c   : > { %v249_v29 = vld [vmem:[%s1584_s19 + $0xa8] sm:$0xff]  ;;  %v258_v30 = vld [vmem:[%s1594_s27 + $0x6] sm:$0x1]  ;;  %v259_v31 = vld [vmem:[%s1594_s27 + $0x7] sm:$0x1]  ;;  %s1418_s8 = sshra.s32 %s1159_s6, 4  ;;  %s1419_s8 = int_to_ptr.hbm [resolvable:$true] %s1418_s8 }
  0x2d   : > { %225 = vst.msk [vmem:[#allocation2 + $0xf] sm:$0x7] %vm1652_vm1, %v1490_v34  ;;  %v260_v40 = vld [vmem:[#allocation2] sm:$0x7]  ;;  %v261_v49 = vld [vmem:[#allocation2 + $0x3] sm:$0x7]  ;;  %p1425_p8 = scmp.lt.s32.totalorder %s1419_s8, %s1809_s2 }
  0x2e   : > { %226 = vst.msk [vmem:[#allocation2 + $0x12] sm:$0x7] %vm1652_vm1, %v1490_v34  ;;  %s1420_s12 = scalar_lea.hbm %s1419_s8, 24  ;;  %s1424_s19 = scalar_lea.hbm %s1809_s2, 48 }
  0x2f   : > { %227 = vst.msk [vmem:[#allocation2 + $0x15] sm:$0x7] %vm1652_vm1, %v1490_v34  ;;  %v262_v58 = vld [vmem:[#allocation2 + $0x6] sm:$0x7]  ;;  %p1421_p5 = scmp.ne.s32.totalorder %s1419_s8, %s1420_s12  ;;  %p1426_p10 = scmp.lt.s32.totalorder %s1424_s19, %s1420_s12 }
  0x30   : > { %1265 = vmatmul.msk.f32.vlgmr.msrb.gmra.mxu0 %vm268_vm0, %v253_v5  ;;  %1267 = vmatmul.msk.f32.vlgmr.msrb.gmra.mxu2 %vm268_vm0, %v254_v14  ;;  %v263_v9 = vld [vmem:[#allocation2 + $0x9] sm:$0x7] }
  0x31   : > { %539 = vmatpush.msrb.mxu0 %v240_v15  ;;  %1268 = vmatmul.msk.f32.vlgmr.msrb.gmra.mxu3 %vm268_vm0, %v254_v14  ;;  %p1422_p6 = pnand %p1421_p5, %p1557_p9  ;;  %p1427_p13 = por %p1426_p10, %p1425_p8 }
  0x32   : > { %579 = vmatpush.msrb.mxu2 %v242_v16  ;;  %1266 = vmatmul.msk.f32.vlgmr.msrb.gmra.mxu1 %vm268_vm0, %v253_v5 }
  0x33   : > { %602 = vmatpush.msrb.mxu3 %v243_v17  ;;  %559 = vmatpush.msrb.mxu1 %v241_v18  ;;  %p1423_p7 = pneg %p1422_p6 }
  0x35   : > { %p1428_p0 = pnand %p1427_p13, %p1423_p7 }
  0x38   : > { %1269 = vmatmul.msk.f32.vlgmr.msra.gmra.mxu0 %vm268_vm0, %v254_v14  ;;  %1271 = vmatmul.msk.f32.vlgmr.msra.gmra.mxu2 %vm268_vm0, %v255_v19 }
  0x39   : > { %622 = vmatpush.msra.mxu0 %v244_v20  ;;  %1272 = vmatmul.msk.f32.vlgmr.msra.gmra.mxu3 %vm268_vm0, %v255_v19 }
  0x3a   : > { %665 = vmatpush.msra.mxu2 %v246_v21  ;;  %1270 = vmatmul.msk.f32.vlgmr.msra.gmra.mxu1 %vm268_vm0, %v255_v19 }
  0x3b   : > { %685 = vmatpush.msra.mxu3 %v247_v22  ;;  %642 = vmatpush.msra.mxu1 %v245_v23 }
  0x40   : > { %1273 = vmatmul.msk.f32.vlgmr.msrb.gmra.mxu0 %vm268_vm0, %v256_v24  ;;  %1275 = vmatmul.msk.f32.vlgmr.msrb.gmra.mxu2 %vm268_vm0, %v256_v24 }
  0x41   : > { %705 = vmatpush.msrb.mxu0 %v248_v25  ;;  %1276 = vmatmul.msk.f32.vlgmr.msrb.gmra.mxu3 %vm268_vm0, %v257_v26 }
  0x42   : > { %748 = vmatpush.msrb.mxu2 %v250_v27  ;;  %1274 = vmatmul.msk.f32.vlgmr.msrb.gmra.mxu1 %vm268_vm0, %v256_v24 }
  0x43   : > { %768 = vmatpush.msrb.mxu3 %v251_v28  ;;  %728 = vmatpush.msrb.mxu1 %v249_v29 }
  0x48   : > { %1277 = vmatmul.msk.f32.vlgmr.msra.gmra.mxu0 %vm268_vm0, %v257_v26  ;;  %1279 = vmatmul.msk.f32.vlgmr.msra.gmra.mxu2 %vm268_vm0, %v258_v30 }
  0x49   : > { %1280 = vmatmul.msk.f32.vlgmr.msra.gmra.mxu3 %vm268_vm0, %v258_v30 }
  0x4a   : > { %1278 = vmatmul.msk.f32.vlgmr.msra.gmra.mxu1 %vm268_vm0, %v257_v26 }
  0x50   : > { %1281 = vmatmul.msk.f32.vlgmr.msrb.gmra.mxu0 %vm268_vm0, %v258_v30  ;;  %1283 = vmatmul.msk.f32.vlgmr.msrb.gmra.mxu2 %vm268_vm0, %v259_v31 }
  0x51   : > { %1284 = vmatmul.msk.f32.vlgmr.msrb.gmra.mxu3 %vm268_vm0, %v259_v31 }
  0x52   : > { %1282 = vmatmul.msk.f32.vlgmr.msrb.gmra.mxu1 %vm268_vm0, %v259_v31  ;;  %v264_v31 = vld [vmem:[#allocation2 + $0xc] sm:$0x7] }
  0xa5   : > { %v289_v35 = vpop.f32.mrf.mxu0 }
  0xa6   : > { %v309_v36 = vpop.f32.mrf.mxu1 }
  0xa7   : > { %v797_v37 = vrot.slane %v309_v36, 7 }
  0xa9   : > { %v814_v38 = vsel %vm813_vm2, %v289_v35, %v797_v37 }
  0xab   : > { %v329_v39 = vpop.f32.mrf.mxu2 }
  0xac   : > { %v798_v41 = vrot.slane %v329_v39, 6  ;;  %v352_v42 = vpop.f32.mrf.mxu3 }
  0xad   : > { %v372_v43 = vpop.f32.mrf.mxu0 }
  0xae   : > { %v799_v44 = vrot.slane %v372_v43, 7  ;;  %v816_v45 = vsel %vm815_vm3, %v814_v38, %v798_v41 }
  0xaf   : > { %v839_v46 = vadd.f32 %v816_v45, %v260_v40  ;;  %v392_v48 = vpop.f32.mrf.mxu1 }
  0xb0   : > { %v817_v47 = vsel %vm813_vm2, %v352_v42, %v799_v44  ;;  %v800_v50 = vrot.slane %v392_v48, 6  ;;  %v265_v48 = vld [vmem:[#allocation2 + $0xf] sm:$0x7] }
  0xb1   : > { %851 = vst.msk [vmem:[#allocation2] sm:$0x7] %vm1652_vm1, %v839_v46 }
  0xb2   : > { %v818_v51 = vsel %vm815_vm3, %v817_v47, %v800_v50 }
  0xb3   : > { %v840_v52 = vadd.f32 %v818_v51, %v261_v49  ;;  %v415_v53 = vpop.f32.mrf.mxu2 }
  0xb4   : > { %v435_v54 = vpop.f32.mrf.mxu3 }
  0xb5   : > { %v455_v55 = vpop.f32.mrf.mxu0  ;;  %852 = vst.msk [vmem:[#allocation2 + $0x3] sm:$0x7] %vm1652_vm1, %v840_v52  ;;  %v801_v56 = vrot.slane %v435_v54, 7 }
  0xb6   : > { %v802_v57 = vrot.slane %v455_v55, 6 }
  0xb7   : > { %v819_v59 = vsel %vm813_vm2, %v415_v53, %v801_v56  ;;  %v478_v60 = vpop.f32.mrf.mxu1 }
  0xb8   : > { %v820_v61 = vsel %vm815_vm3, %v819_v59, %v802_v57  ;;  %v1682_v62 = vld [vmem:[#allocation2] sm:$0x7] }
  0xb9   : > { %v841_v63 = vadd.f32 %v820_v61, %v262_v58  ;;  %v870_v0 = vmul.f32 %v1682_v62, %v1682_v62 }
  0xbb   : > { %853 = vst.msk [vmem:[#allocation2 + $0x6] sm:$0x7] %vm1652_vm1, %v841_v63  ;;  %v498_v1 = vpop.f32.mrf.mxu2  ;;  %v886_v2 = vperm.slane %v870_v0, 0  ;;  %v887_v3 = vperm.slane %v870_v0, 1  ;;  %v888_v4 = vperm.slane %v870_v0, 2 }
  0xbc   : > { %v803_v5 = vrot.slane %v498_v1, 7  ;;  %v518_v6 = vpop.f32.mrf.mxu3  ;;  %v1688_v8 = vld [vmem:[#allocation2 + $0x3] sm:$0x7] }
  0xbd   : > { %v541_v7 = vpop.f32.mrf.mxu0  ;;  %v804_v10 = vrot.slane %v518_v6, 6  ;;  %v934_v11 = vsel %vm813_vm2, %v886_v2, 0.0  ;;  %v935_v12 = vsel %vm813_vm2, %v887_v3, 0.0  ;;  %v871_v15 = vmul.f32 %v1688_v8, %v1688_v8  ;;  %v266_v3 = vld [vmem:[#allocation2 + $0x12] sm:$0x7] }
  0xbe   : > { %v821_v13 = vsel %vm813_vm2, %v478_v60, %v803_v5  ;;  %v936_v14 = vadd.f32 %v935_v12, %v934_v11  ;;  %v937_v18 = vsel %vm813_vm2, %v888_v4, 0.0 }
  0xbf   : > { %v822_v16 = vsel %vm815_vm3, %v821_v13, %v804_v10  ;;  %v561_v17 = vpop.f32.mrf.mxu1  ;;  %v889_v22 = vperm.slane %v871_v15, 0  ;;  %v890_v23 = vperm.slane %v871_v15, 1  ;;  %v891_v24 = vperm.slane %v871_v15, 2 }
  0xc0   : > { %v842_v19 = vadd.f32 %v822_v16, %v263_v9  ;;  %v805_v20 = vrot.slane %v561_v17, 7  ;;  %v938_v21 = vadd.f32 %v937_v18, %v936_v14 }
  0xc1   : > { %v941_v25 = vsel %vm813_vm2, %v889_v22, 0.0  ;;  %v942_v29 = vsel %vm813_vm2, %v890_v23, 0.0  ;;  %v944_v42 = vsel %vm813_vm2, %v891_v24, 0.0  ;;  %v267_v24 = vld [vmem:[#allocation2 + $0x15] sm:$0x7] }
  0xc2   : > { %854 = vst.msk [vmem:[#allocation2 + $0x9] sm:$0x7] %vm1652_vm1, %v842_v19  ;;  %939 = vadd.xlane.f32.xlu0 %v938_v21  ;;  %v1700_v26 = vld [vmem:[#allocation2 + $0x6] sm:$0x7]  ;;  %v823_v27 = vsel %vm813_vm2, %v541_v7, %v805_v20  ;;  %v943_v36 = vadd.f32 %v942_v29, %v941_v25 }
  0xc3   : > { %v581_v28 = vpop.f32.mrf.mxu2  ;;  %v872_v30 = vmul.f32 %v1700_v26, %v1700_v26 }
  0xc4   : > { %v806_v32 = vrot.slane %v581_v28, 6  ;;  %v604_v34 = vpop.f32.mrf.mxu3  ;;  %v945_v50 = vadd.f32 %v944_v42, %v943_v36 }
  0xc5   : > { %v624_v35 = vpop.f32.mrf.mxu0  ;;  %v892_v38 = vperm.slane %v872_v30, 0  ;;  %v893_v39 = vperm.slane %v872_v30, 1  ;;  %v894_v40 = vperm.slane %v872_v30, 2 }
  0xc6   : > { %v807_v37 = vrot.slane %v624_v35, 7  ;;  %v824_v41 = vsel %vm815_vm3, %v823_v27, %v806_v32 }
  0xc7   : > { %v843_v43 = vadd.f32 %v824_v41, %v264_v31  ;;  %v644_v45 = vpop.f32.mrf.mxu1  ;;  %v948_v46 = vsel %vm813_vm2, %v892_v38, 0.0  ;;  %v949_v47 = vsel %vm813_vm2, %v893_v39, 0.0  ;;  %v951_v52 = vsel %vm813_vm2, %v894_v40, 0.0 }
  0xc8   : > { %v825_v44 = vsel %vm813_vm2, %v604_v34, %v807_v37  ;;  %v808_v49 = vrot.slane %v644_v45, 6  ;;  %v950_v51 = vadd.f32 %v949_v47, %v948_v46 }
  0xc9   : > { %855 = vst.msk [vmem:[#allocation2 + $0xc] sm:$0x7] %vm1652_vm1, %v843_v43  ;;  %v1714_v53 = vld [vmem:[#allocation2 + $0x9] sm:$0x7] }
  0xca   : > { %v826_v54 = vsel %vm815_vm3, %v825_v44, %v808_v49  ;;  %946 = vadd.xlane.f32.xlu0 %v945_v50  ;;  %v952_v55 = vadd.f32 %v951_v52, %v950_v51  ;;  %v873_v56 = vmul.f32 %v1714_v53, %v1714_v53 }
  0xcb   : > { %v844_v57 = vadd.f32 %v826_v54, %v265_v48  ;;  %v667_v58 = vpop.f32.mrf.mxu2 }
  0xcc   : > { %v687_v59 = vpop.f32.mrf.mxu3  ;;  %953 = vadd.xlane.f32.xlu1 %v952_v55  ;;  %v895_v61 = vperm.slane %v873_v56, 0  ;;  %v896_v63 = vperm.slane %v873_v56, 1  ;;  %v897_v0 = vperm.slane %v873_v56, 2 }
  0xcd   : > { %v707_v60 = vpop.f32.mrf.mxu0  ;;  %856 = vst.msk [vmem:[#allocation2 + $0xf] sm:$0x7] %vm1652_vm1, %v844_v57  ;;  %v809_v1 = vrot.slane %v687_v59, 7 }
  0xce   : > { %v810_v2 = vrot.slane %v707_v60, 6  ;;  %v955_v4 = vsel %vm813_vm2, %v895_v61, 0.0  ;;  %v956_v5 = vsel %vm813_vm2, %v896_v63, 0.0  ;;  %v958_v10 = vsel %vm813_vm2, %v897_v0, 0.0 }
  0xcf   : > { %v827_v6 = vsel %vm813_vm2, %v667_v58, %v809_v1  ;;  %v957_v7 = vadd.f32 %v956_v5, %v955_v4  ;;  %v730_v16 = vpop.f32.mrf.mxu1 }
  0xd0   : > { %v828_v9 = vsel %vm815_vm3, %v827_v6, %v810_v2  ;;  %v1726_v11 = vld [vmem:[#allocation2 + $0xc] sm:$0x7] }
  0xd1   : > { %v845_v12 = vadd.f32 %v828_v9, %v266_v3  ;;  %v959_v13 = vadd.f32 %v958_v10, %v957_v7  ;;  %v874_v14 = vmul.f32 %v1726_v11, %v1726_v11 }
  0xd3   : > { %857 = vst.msk [vmem:[#allocation2 + $0x12] sm:$0x7] %vm1652_vm1, %v845_v12  ;;  %v750_v15 = vpop.f32.mrf.mxu2  ;;  %v898_v17 = vperm.slane %v874_v14, 0  ;;  %v899_v18 = vperm.slane %v874_v14, 1  ;;  %v900_v19 = vperm.slane %v874_v14, 2 }
  0xd4   : > { %v811_v20 = vrot.slane %v750_v15, 7  ;;  %v770_v21 = vpop.f32.mrf.mxu3  ;;  %960 = vadd.xlane.f32.xlu1 %v959_v13  ;;  %v1732_v22 = vld [vmem:[#allocation2 + $0xf] sm:$0x7] }
  0xd5   : > { %v812_v23 = vrot.slane %v770_v21, 6  ;;  %v962_v25 = vsel %vm813_vm2, %v898_v17, 0.0  ;;  %v963_v27 = vsel %vm813_vm2, %v899_v18, 0.0  ;;  %v875_v30 = vmul.f32 %v1732_v22, %v1732_v22 }
  0xd6   : > { %v829_v28 = vsel %vm813_vm2, %v730_v16, %v811_v20  ;;  %v964_v29 = vadd.f32 %v963_v27, %v962_v25  ;;  %v965_v32 = vsel %vm813_vm2, %v900_v19, 0.0 }
  0xd7   : > { %v830_v31 = vsel %vm815_vm3, %v829_v28, %v812_v23  ;;  %v901_v36 = vperm.slane %v875_v30, 0  ;;  %v902_v37 = vperm.slane %v875_v30, 1  ;;  %v903_v41 = vperm.slane %v875_v30, 2 }
  0xd8   : > { %v846_v34 = vadd.f32 %v830_v31, %v267_v24  ;;  %v966_v35 = vadd.f32 %v965_v32, %v964_v29 }
  0xd9   : > { %v969_v38 = vsel %vm813_vm2, %v901_v36, 0.0  ;;  %v970_v39 = vsel %vm813_vm2, %v902_v37, 0.0  ;;  %v972_v47 = vsel %vm813_vm2, %v903_v41, 0.0 }
  0xda   : > { %858 = vst.msk [vmem:[#allocation2 + $0x15] sm:$0x7] %vm1652_vm1, %v846_v34  ;;  %967 = vadd.xlane.f32.xlu2 %v966_v35  ;;  %v1745_v40 = vld [vmem:[#allocation2 + $0x12] sm:$0x7]  ;;  %v971_v43 = vadd.f32 %v970_v39, %v969_v38 }
  0xdb   : > { %v876_v42 = vmul.f32 %v1745_v40, %v1745_v40 }
  0xdc   : > { %v973_v49 = vadd.f32 %v972_v47, %v971_v43 }
  0xdd   : > { %v904_v44 = vperm.slane %v876_v42, 0  ;;  %v905_v45 = vperm.slane %v876_v42, 1  ;;  %v906_v46 = vperm.slane %v876_v42, 2 }
  0xdf   : > { %v976_v33 = vsel %vm813_vm2, %v904_v44, 0.0  ;;  %v977_v48 = vsel %vm813_vm2, %v905_v45, 0.0  ;;  %v979_v51 = vsel %vm813_vm2, %v906_v46, 0.0 }
  0xe0   : > { %v978_v50 = vadd.f32 %v977_v48, %v976_v33 }
  0xe1   : > { %v1753_v52 = vld [vmem:[#allocation2 + $0x15] sm:$0x7] }
  0xe2   : > { %974 = vadd.xlane.f32.xlu2 %v973_v49  ;;  %v980_v54 = vadd.f32 %v979_v51, %v978_v50  ;;  %v877_v55 = vmul.f32 %v1753_v52, %v1753_v52 }
  0xe4   : > { %981 = vadd.xlane.f32.xlu0 %v980_v54  ;;  %v907_v56 = vperm.slane %v877_v55, 0  ;;  %v908_v57 = vperm.slane %v877_v55, 1  ;;  %v909_v58 = vperm.slane %v877_v55, 2 }
  0xe6   : > { %v983_v59 = vsel %vm813_vm2, %v907_v56, 0.0  ;;  %v984_v60 = vsel %vm813_vm2, %v908_v57, 0.0  ;;  %v986_v63 = vsel %vm813_vm2, %v909_v58, 0.0 }
  0xe7   : > { %v985_v61 = vadd.f32 %v984_v60, %v983_v59 }
  0xe9   : > { %v987_v0 = vadd.f32 %v986_v63, %v985_v61 }
  0xeb   : > { %988 = vadd.xlane.f32.xlu1 %v987_v0 }
 0x135   : > { %v940_v1 = vpop.xlane.xlu0 %939 }
 0x136   : > { %v990_v2 = vmax.f32 %v940_v1, 1e-24 }
 0x138   : > { %1358 = vrsqrt.f32 %v990_v2  ;;  %vm1004_vm5 = vweird.f32 %v990_v2 }
 0x13d   : > { %v947_v3 = vpop.xlane.xlu0 %946 }
 0x13e   : > { %v1359_v4 = vpop.eup %1358  ;;  %v991_v5 = vmax.f32 %v947_v3, 1e-24 }
 0x13f   : > { %v999_v6 = vmul.f32 %v1359_v4, %v990_v2  ;;  %v954_v7 = vpop.xlane.xlu1 %953  ;;  %vm1005_vm4 = vweird.f32 %v1359_v4 }
 0x140   : > { %1360 = vrsqrt.f32 %v991_v5  ;;  %v992_v9 = vmax.f32 %v954_v7, 1e-24  ;;  %vm1006_vm6 = vmor %vm1004_vm5, %vm1005_vm4  ;;  %vm1014_vm8 = vweird.f32 %v991_v5 }
 0x141   : > { %v1000_v10 = vmul.f32 %v1359_v4, %v999_v6 }
 0x142   : > { %1362 = vrsqrt.f32 %v992_v9  ;;  %vm1024_vm11 = vweird.f32 %v992_v9 }
 0x143   : > { %v1001_v12 = vmul.f32 0.5, %v1000_v10 }
 0x145   : > { %v1002_v13 = vsub.f32 1.5, %v1001_v12 }
 0x146   : > { %v1361_v14 = vpop.eup %1360 }
 0x147   : > { %v1003_v15 = vmul.f32 %v1359_v4, %v1002_v13  ;;  %v1009_v16 = vmul.f32 %v1361_v14, %v991_v5  ;;  %v961_v17 = vpop.xlane.xlu1 %960  ;;  %vm1015_vm7 = vweird.f32 %v1361_v14 }
 0x148   : > { %v1363_v18 = vpop.eup %1362  ;;  %v993_v19 = vmax.f32 %v961_v17, 1e-24  ;;  %vm1016_vm10 = vmor %vm1014_vm8, %vm1015_vm7 }
 0x149   : > { %v1007_v20 = vsel %vm1006_vm6, %v1359_v4, %v1003_v15  ;;  %v1010_v21 = vmul.f32 %v1361_v14, %v1009_v16  ;;  %v1019_v23 = vmul.f32 %v1363_v18, %v992_v9  ;;  %vm1025_vm9 = vweird.f32 %v1363_v18 }
 0x14a   : > { %v1086_v24 = vperm.slane %v1007_v20, 0  ;;  %1364 = vrsqrt.f32 %v993_v19  ;;  %vm1026_vm12 = vmor %vm1024_vm11, %vm1025_vm9  ;;  %vm1034_vm14 = vweird.f32 %v993_v19 }
 0x14b   : > { %v1011_v25 = vmul.f32 0.5, %v1010_v21  ;;  %v1020_v27 = vmul.f32 %v1363_v18, %v1019_v23 }
 0x14c   : > { %v1102_v28 = vmul.f32 %v1086_v24, %v1682_v62 }
 0x14d   : > { %v1012_v29 = vsub.f32 1.5, %v1011_v25  ;;  %v1021_v30 = vmul.f32 0.5, %v1020_v27  ;;  %v968_v31 = vpop.xlane.xlu2 %967 }
 0x14e   : > { %1118 = vst [vmem:[#allocation1] ss:$9 sm:$0xff] %v1102_v28  ;;  %v994_v32 = vmax.f32 %v968_v31, 1e-24 }
 0x14f   : > { %v1013_v34 = vmul.f32 %v1361_v14, %v1012_v29  ;;  %v1022_v35 = vsub.f32 1.5, %v1021_v30 }
 0x150   : > { %v1365_v36 = vpop.eup %1364  ;;  %1366 = vrsqrt.f32 %v994_v32  ;;  %vm1044_vm1 = vweird.f32 %v994_v32 }
 0x151   : > { %v1017_v37 = vsel %vm1016_vm10, %v1361_v14, %v1013_v34  ;;  %v1023_v38 = vmul.f32 %v1363_v18, %v1022_v35  ;;  %v1029_v39 = vmul.f32 %v1365_v36, %v993_v19  ;;  %vm1035_vm13 = vweird.f32 %v1365_v36 }
 0x152   : > { %v1087_v41 = vperm.slane %v1017_v37, 0  ;;  %vm1036_vm15 = vmor %vm1034_vm14, %vm1035_vm13 }
 0x153   : > { %v1027_v62 = vsel %vm1026_vm12, %v1363_v18, %v1023_v38  ;;  %v1030_v42 = vmul.f32 %v1365_v36, %v1029_v39 }
 0x154   : > { %v1103_v43 = vmul.f32 %v1087_v41, %v1688_v8  ;;  %v1088_v44 = vperm.slane %v1027_v62, 0 }
 0x155   : > { %v1031_v45 = vmul.f32 0.5, %v1030_v42  ;;  %v975_v46 = vpop.xlane.xlu2 %974 }
 0x156   : > { %v1367_v47 = vpop.eup %1366  ;;  %1120 = vst [vmem:[#allocation1 + $0x1] ss:$9 sm:$0xff] %v1103_v43  ;;  %v1104_v33 = vmul.f32 %v1088_v44, %v1700_v26  ;;  %v995_v48 = vmax.f32 %v975_v46, 1e-24 }
 0x157   : > { %v1032_v49 = vsub.f32 1.5, %v1031_v45  ;;  %v1039_v50 = vmul.f32 %v1367_v47, %v994_v32  ;;  %v982_v51 = vpop.xlane.xlu0 %981  ;;  %vm1045_vm0 = vweird.f32 %v1367_v47 }
 0x158   : > { %1122 = vst [vmem:[#allocation1 + $0x2] ss:$9 sm:$0xff] %v1104_v33  ;;  %1368 = vrsqrt.f32 %v995_v48  ;;  %v996_v54 = vmax.f32 %v982_v51, 1e-24  ;;  %vm1046_vm2 = vmor %vm1044_vm1, %vm1045_vm0  ;;  %vm1054_vm4 = vweird.f32 %v995_v48 }
 0x159   : > { %v1033_v55 = vmul.f32 %v1365_v36, %v1032_v49  ;;  %v1040_v56 = vmul.f32 %v1367_v47, %v1039_v50 }
 0x15a   : > { %1370 = vrsqrt.f32 %v996_v54  ;;  %vm1064_vm7 = vweird.f32 %v996_v54 }
 0x15b   : > { %v1037_v8 = vsel %vm1036_vm15, %v1365_v36, %v1033_v55  ;;  %v1041_v57 = vmul.f32 0.5, %v1040_v56 }
 0x15c   : > { %v1089_v58 = vperm.slane %v1037_v8, 0 }
 0x15d   : > { %v1042_v59 = vsub.f32 1.5, %v1041_v57 }
 0x15e   : > { %v1369_v60 = vpop.eup %1368  ;;  %v1105_v26 = vmul.f32 %v1089_v58, %v1714_v53  ;;  %v989_v61 = vpop.xlane.xlu1 %988 }
 0x15f   : > { %v1043_v63 = vmul.f32 %v1367_v47, %v1042_v59  ;;  %v1049_v0 = vmul.f32 %v1369_v60, %v995_v48  ;;  %v997_v1 = vmax.f32 %v989_v61, 1e-24  ;;  %vm1055_vm3 = vweird.f32 %v1369_v60 }
 0x160   : > { %v1371_v2 = vpop.eup %1370  ;;  %1124 = vst [vmem:[#allocation1 + $0x3] ss:$9 sm:$0xff] %v1105_v26  ;;  %vm1056_vm6 = vmor %vm1054_vm4, %vm1055_vm3 }
 0x161   : > { %v1047_v3 = vsel %vm1046_vm2, %v1367_v47, %v1043_v63  ;;  %v1050_v4 = vmul.f32 %v1369_v60, %v1049_v0  ;;  %v1059_v5 = vmul.f32 %v1371_v2, %v996_v54  ;;  %1372 = vrsqrt.f32 %v997_v1 }
 0x162   : > { %v1090_v6 = vperm.slane %v1047_v3, 0  ;;  %vm1065_vm5 = vweird.f32 %v1371_v2  ;;  %vm1074_vm10 = vweird.f32 %v997_v1 }
 0x163   : > { %v1051_v7 = vmul.f32 0.5, %v1050_v4  ;;  %v1060_v9 = vmul.f32 %v1371_v2, %v1059_v5  ;;  %vm1066_vm8 = vmor %vm1064_vm7, %vm1065_vm5 }
 0x164   : > { %v1106_v10 = vmul.f32 %v1090_v6, %v1726_v11 }
 0x165   : > { %v1052_v12 = vsub.f32 1.5, %v1051_v7  ;;  %v1061_v53 = vmul.f32 0.5, %v1060_v9 }
 0x166   : > { %1126 = vst [vmem:[#allocation1 + $0x4] ss:$9 sm:$0xff] %v1106_v10 }
 0x167   : > { %v1053_v13 = vmul.f32 %v1369_v60, %v1052_v12  ;;  %v1062_v14 = vsub.f32 1.5, %v1061_v53  ;;  %v1373_v15 = vpop.eup %1372 }
 0x168   : > { %v1069_v18 = vmul.f32 %v1373_v15, %v997_v1  ;;  %vm1075_vm9 = vweird.f32 %v1373_v15 }
 0x169   : > { %v1057_v16 = vsel %vm1056_vm6, %v1369_v60, %v1053_v13  ;;  %v1063_v17 = vmul.f32 %v1371_v2, %v1062_v14  ;;  %vm1076_vm11 = vmor %vm1074_vm10, %vm1075_vm9 }
 0x16a   : > { %v1091_v19 = vperm.slane %v1057_v16, 0  ;;  %v1070_v21 = vmul.f32 %v1373_v15, %v1069_v18 }
 0x16b   : > { %v1067_v20 = vsel %vm1066_vm8, %v1371_v2, %v1063_v17 }
 0x16c   : > { %v1107_v11 = vmul.f32 %v1091_v19, %v1732_v22  ;;  %v1092_v23 = vperm.slane %v1067_v20, 0  ;;  %v1071_v24 = vmul.f32 0.5, %v1070_v21 }
 0x16e   : > { %1128 = vst [vmem:[#allocation1 + $0x5] ss:$9 sm:$0xff] %v1107_v11  ;;  %v1108_v25 = vmul.f32 %v1092_v23, %v1745_v40  ;;  %v1072_v27 = vsub.f32 1.5, %v1071_v24 }
 0x170   : > { %1130 = vst [vmem:[#allocation1 + $0x6] ss:$9 sm:$0xff] %v1108_v25  ;;  %v1073_v28 = vmul.f32 %v1373_v15, %v1072_v27 }
 0x172   : > { %v1077_v29 = vsel %vm1076_vm11, %v1373_v15, %v1073_v28 }
 0x173   : > { %v1093_v30 = vperm.slane %v1077_v29, 0 }
 0x175   : > { %v1109_v31 = vmul.f32 %v1093_v30, %v1753_v52 }
 0x177   : > { %1132 = vst [vmem:[#allocation1 + $0x7] ss:$9 sm:$0xff] %v1109_v31 }
 0x17e   : > { %v1133_v22 = vld [vmem:[#allocation1] sm:$0xff]  ;;  %v1134_v40 = vld [vmem:[#allocation1 + $0x9] sm:$0xff]  ;;  %v1135_v32 = vld [vmem:[#allocation1 + $0x12] sm:$0xff] }
 0x17f   : > { %1139 = vst [vmem:[%s202_s4] sm:$0xff] %v1133_v22 }
 0x180   : > { %1140 = vst [vmem:[%s202_s4 + $0x8] sm:$0xff] %v1134_v40 }
 0x181   : > { %1141 = vst [vmem:[%s202_s4 + $0x10] sm:$0xff] %v1135_v32 }
 0x182   : > { %1431 = shalt.err (!%p1428_p0)
}
 0x183   : > { %1295 = dma.vmem_to_hbm [thread:$0]  (%p1557_p9), %s1157_s5, 384, %s1159_s6, %s1143_s7  }
 0x184 PF: > { %s1170_s15 = sand.u32 1, %s1466_s9   ;;  %p1302_p1 = pnand %p1255_p12, %p1564_p11 }
 0x185   : > { %s1171_s26 = scalar_lea.sflag [#allocation5], %s1170_s15 }
 0x186   : > { %p1303_p2 = pneg %p1302_p1 }
 0x188   : > { %1461 = dma.done.wait (%p1303_p2), %s1171_s26, 384  }
 0x189   : > { %1463 = vsyncadd (%p1303_p2), %s1171_s26, 4294966912  ;;  %s18_s14 = sadd.s32 1, %s1486_s14   ;;  %s1816_s9 = smov %s1470_s10 }
 0x18a   : > { %p15_p3 = scmp.ge.s32.totalorder %s18_s14, 4   ;;  %s1817_s10 = smov %s1474_s11 }
 0x18b   : > { %s1818_s11 = smov %s1562_s23  ;;  %s1819_s12 = smov %s1482_s13 }
 0x18c   : > { %s1820_s13 = smov %s1822_s17  ;;  %17 = sbr.rel (!%p15_p3) target bundleno = 6 (0x6), region = 91 }
 0x191   :  { %1177 = vsyncpa [#allocation4], 1 }
 0x192   :  { %1179 = vsyncpa [#allocation4 + $0x1], 1 }
 0x193   :  { %1180 = vsyncpa [#allocation5], 1 }
 0x194   :  { %1182 = vsyncpa [#allocation5 + $0x1], 1 }

</bundles_post_ra>
